<compile_context>
chip_gen: v7x
topology: tpu7x:2x2x1
jax: 0.10.0
libtpu: 0.0.40
codegen_flags: <defaults>
</compile_context>

<pallas_src>
import jax
import jax.numpy as jnp
from jax import lax
from jax.experimental import pallas as pl
from jax.experimental.pallas import tpu as pltpu


def _pooler_kernel(x_ref, w_ref, b_ref, o_ref):
    # x_ref: (TB, H_in) CLS activations
    # w_ref: (H_out, H_in) weight in native PyTorch layout (VMEM-resident)
    # b_ref: (1, H_out) bias
    # o_ref: (TB, H_out)
    x = x_ref[...]
    w = w_ref[...]
    if w.dtype != x.dtype:
        # Unify MXU operand dtypes (e.g. bf16 activations + f32 weights
        # -> bf16 matmul instead of a silent f32 promotion).
        w = w.astype(x.dtype)
    acc = lax.dot_general(
        x, w,
        dimension_numbers=(((1,), (1,)), ((), ())),   # x @ W.T (NT) on the MXU
        preferred_element_type=jnp.float32,           # f32 accumulation
    )
    acc = acc + b_ref[...].astype(jnp.float32)        # bias add in f32
    o_ref[...] = jnp.tanh(acc).astype(o_ref.dtype)    # tanh on the EUP (f32)


def _round_up(x, m):
    return ((x + m - 1) // m) * m


def bert_pooler(hidden_states, weight, bias):
    """hidden_states: (B, S, H_in); weight: (H_out, H_in) (PyTorch layout);
    bias: (H_out,). Returns (B, H_out) = tanh(hidden_states[:, 0] @ W.T + b)."""
    B, S, H_in = hidden_states.shape
    H_out, H_in_w = weight.shape
    assert H_in_w == H_in

    out_dtype = hidden_states.dtype
    b2d = bias.reshape(1, H_out)

    # ---- CLS extraction fused into the kernel's DMA -------------------------
    # (B, S, H) viewed as (B, S*H) is a free reshape; the CLS token of row b is
    # lanes [0, H) of that row, so a (TB, H) block at column-block 0 pulls only
    # the needed B*H elements (strided HBM DMA, row stride S*H). Needs the
    # block's lane dim (H) to be a multiple of 128; otherwise fall back to a
    # wrapper-side slice (only hit for toy hidden sizes).
    if H_in % 128 == 0:
        x2d = hidden_states.reshape(B, S * H_in)
    else:
        x2d = hidden_states[:, 0, :]

    # ---- batch tiling --------------------------------------------------------
    if B <= 128:
        TB = B  # one tile; block == full batch dim, legal for any B
    else:
        # >= 2 tiles so the "parallel" axis can split across v7x's 2 TensorCores,
        # capped at 512 rows so f32 double-buffered act/out tiles + the resident
        # weight stay well under the requested 32 MiB VMEM on every generation.
        TB = min(512, _round_up(pl.cdiv(B, 2), 64))
    grid = (pl.cdiv(B, TB),)

    itm = lambda a: jnp.dtype(a.dtype).itemsize
    cost = pl.CostEstimate(
        flops=2 * B * H_in * H_out,
        transcendentals=B * H_out,
        bytes_accessed=(itm(hidden_states) * B * H_in       # CLS rows read once
                        + itm(weight) * H_out * H_in        # weight read once (resident)
                        + itm(bias) * H_out
                        + jnp.dtype(out_dtype).itemsize * B * H_out),
    )

    return pl.pallas_call(
        _pooler_kernel,
        out_shape=jax.ShapeDtypeStruct((B, H_out), out_dtype),
        grid_spec=pltpu.PrefetchScalarGridSpec(
            num_scalar_prefetch=0,
            grid=grid,
            in_specs=[
                # Activation tile: strided CLS rows straight from hidden_states.
                pl.BlockSpec((TB, H_in), lambda i: (i, 0)),
                # Weight / bias: constant index map -> fetched once, VMEM-resident;
                # single-buffered so no dead second copy is allocated.
                pl.BlockSpec((H_out, H_in), lambda i: (0, 0),
                             pipeline_mode=pl.Buffered(1)),
                pl.BlockSpec((1, H_out), lambda i: (0, 0),
                             pipeline_mode=pl.Buffered(1)),
            ],
            out_specs=pl.BlockSpec((TB, H_out), lambda i: (i, 0)),
        ),
        compiler_params=pltpu.CompilerParams(
            dimension_semantics=("parallel",),        # split batch tiles across TCs
            vmem_limit_bytes=32 * 1024 * 1024,        # headroom on v5e's 16 MiB default
        ),
        cost_estimate=cost,
    )(x2d, weight, b2d)


def bert_pooler_ref(hidden_states, weight, bias):
    """Pure-JAX reference matching the PyTorch forward semantics."""
    first = hidden_states[:, 0]
    return jnp.tanh(first @ weight.T + bias).astype(hidden_states.dtype)


if __name__ == "__main__":
    key = jax.random.PRNGKey(0)
    k1, k2, k3, k4 = jax.random.split(key, 4)

    # Main config (BERT-tiny-like hidden=128): exercises the fused CLS path.
    B, S, H = 2, 8, 128
    hidden_states = jax.random.normal(k1, (B, S, H), dtype=jnp.float32)
    weight = jax.random.normal(k2, (H, H), dtype=jnp.float32) * 0.02
    bias = jax.random.normal(k3, (H,), dtype=jnp.float32) * 0.02

    out = jax.block_until_ready(jax.jit(bert_pooler)(hidden_states, weight, bias))
    ref = bert_pooler_ref(hidden_states, weight, bias)
    assert out.shape == (B, H)
    assert jnp.allclose(out, ref, atol=1e-4, rtol=1e-4)

    # Fallback path (hidden not a multiple of 128): wrapper-side CLS slice.
    H2 = 32
    hs2 = jax.random.normal(k4, (B, S, H2), dtype=jnp.float32)
    w2 = weight[:H2, :H2]
    b2 = bias[:H2]
    out2 = jax.block_until_ready(jax.jit(bert_pooler)(hs2, w2, b2))
    ref2 = bert_pooler_ref(hs2, w2, b2)
    assert out2.shape == (B, H2)
    assert jnp.allclose(out2, ref2, atol=1e-4, rtol=1e-4)

    print("KERNEL_OK")
</pallas_src>

<mosaic_0001>
module attributes {stable_mosaic.version = 11 : i64} {
  func.func @_pooler_kernel(%arg0: i32, %arg1: memref<2x128xf32, #tpu.memory_space<vmem>>, %arg2: memref<128x128xf32, #tpu.memory_space<vmem>>, %arg3: memref<1x128xf32, #tpu.memory_space<vmem>>, %arg4: memref<2x128xf32, #tpu.memory_space<vmem>>) attributes {dimension_semantics = [#tpu.dimension_semantics<parallel>], iteration_bounds = array<i64: 1>, scalar_prefetch = 0 : i64, scratch_operands = 0 : i64, tpu.core_type = #tpu.core_type<tc>, window_params = [{transform_indices = @transform_0, window_bounds = array<i64: 2, 128>}, {pipeline_mode = #tpu.pipeline_mode<synchronous>, transform_indices = @transform_1, window_bounds = array<i64: 128, 128>}, {pipeline_mode = #tpu.pipeline_mode<synchronous>, transform_indices = @transform_2, window_bounds = array<i64: 1, 128>}, {transform_indices = @transform_3, window_bounds = array<i64: 2, 128>}]} {
    %c0 = arith.constant 0 : index
    %c0_0 = arith.constant 0 : index
    %0 = vector.load %arg1[%c0, %c0_0] : memref<2x128xf32, #tpu.memory_space<vmem>>, vector<2x128xf32>
    %c0_1 = arith.constant 0 : index
    %c0_2 = arith.constant 0 : index
    %1 = vector.load %arg2[%c0_1, %c0_2] : memref<128x128xf32, #tpu.memory_space<vmem>>, vector<128x128xf32>
    %cst = arith.constant dense<0.000000e+00> : vector<2x128xf32>
    %2 = tpu.matmul %0, %1, %cst {dimension_numbers = #tpu.dot_dimension_numbers<[1], [1], [0], [0], [0, 0, 1, 0], [], []>} : vector<2x128xf32>, vector<128x128xf32>, vector<2x128xf32> -> vector<2x128xf32>
    %c0_3 = arith.constant 0 : index
    %c0_4 = arith.constant 0 : index
    %3 = vector.load %arg3[%c0_3, %c0_4] : memref<1x128xf32, #tpu.memory_space<vmem>>, vector<1x128xf32>
    %4 = vector.broadcast %3 : vector<1x128xf32> to vector<2x128xf32>
    %5 = arith.addf %2, %4 : vector<2x128xf32>
    %6 = math.tanh %5 : vector<2x128xf32>
    %c0_5 = arith.constant 0 : index
    %c0_6 = arith.constant 0 : index
    %7 = vector.load %arg4[%c0_5, %c0_6] : memref<2x128xf32, #tpu.memory_space<vmem>>, vector<2x128xf32>
    tpu.vector_store %arg4[%c0_5, %c0_6], %6 {strides = array<i32>} : memref<2x128xf32, #tpu.memory_space<vmem>>, vector<2x128xf32>,
    return
  }
  func.func @transform_0(%arg0: i32) -> (i32, i32) {
    %c0_i32 = arith.constant 0 : i32
    %c0_i32_0 = arith.constant 0 : i32
    return %arg0, %c0_i32 : i32, i32
  }
  func.func @transform_1(%arg0: i32) -> (i32, i32) {
    %c0_i32 = arith.constant 0 : i32
    %c0_i32_0 = arith.constant 0 : i32
    %c0_i32_1 = arith.constant 0 : i32
    return %c0_i32, %c0_i32_0 : i32, i32
  }
  func.func @transform_2(%arg0: i32) -> (i32, i32) {
    %c0_i32 = arith.constant 0 : i32
    %c0_i32_0 = arith.constant 0 : i32
    %c0_i32_1 = arith.constant 0 : i32
    return %c0_i32, %c0_i32_0 : i32, i32
  }
  func.func @transform_3(%arg0: i32) -> (i32, i32) {
    %c0_i32 = arith.constant 0 : i32
    %c0_i32_0 = arith.constant 0 : i32
    return %arg0, %c0_i32 : i32, i32
  }
}

</mosaic_0001>

<bundles_post_ra>
// kernel: bert_pooler.1
= control target key start
LH: loop header
LB: loop body
LE: loop exit
PB: predicated region body
PF: predicated region fallthrough
CT: control target
= control target key end

     0   :  { %8 = vsyncpa [#allocation3], 0  ;;  %s331_s0 = inlined_call_operand.vmem [shape: f32[2,1024], index: 0, kind: input, shape index: {}]   ;;  %s332_s1 = inlined_call_operand.hbm [shape: f32[128,128], index: 1, kind: input, shape index: {}]   ;;  %s333_s2 = inlined_call_operand.vmem [shape: f32[1,128], index: 2, kind: input, shape index: {}]   ;;  %s334_s3 = inlined_call_operand.hbm [shape: f32[2,128], index: 3, kind: output, shape index: {}]  }
   0x1   :  { %9 = vsyncpa [#allocation4], 0  ;;  %s274_s12 = smov [#allocation2]   ;;  %s226_s16 = scalar_lea.hbm %s332_s1, 2048 }
   0x2   :  { %s17_s13 = sshll.u32 %s274_s12, 4  ;;  %p227_p0 = scmp.ne.s32.totalorder %s332_s1, %s226_s16  ;;  %s18_s13 = int_to_ptr.vmem [resolvable:$true] %s17_s13 }
   0x3   :  { %p230_p1 = scmp.lt.u32.totalorder %s226_s16, %s332_s1 }
   0x5   :  { %p232_p2 = pnand %p230_p1, %p227_p0 }
   0x7   :  { %235 = shalt.err (!%p232_p2)
}
   0x8   :  { %s236_s21 = scalar_lea.vmem %s18_s13, 2048  ;;  %p241_p4 = scmp.lt.s32.totalorder %s18_s13, %s18_s13 }
   0x9   :  { %p237_p3 = scmp.ne.s32.totalorder %s18_s13, %s236_s21  ;;  %p242_p5 = scmp.lt.s32.totalorder %s236_s21, %s236_s21 }
   0xb   :  { %p243_p6 = por %p242_p5, %p241_p4 }
   0xd   :  { %p244_p7 = pnand %p243_p6, %p237_p3 }
   0xf   :  { %247 = shalt.err (!%p244_p7)
}
  0x10   :  { %s275_s22 = smov 128   ;;  %s276_s23 = smov 8  }
  0x11   :  { %23 = dma.hbm_to_vmem [thread:$0]  %s332_s1, 2048, %s18_s13, [#allocation3], %s275_s22, %s275_s22, %s276_s23  }
  0x12   :  { %270 = dma.done.wait [#allocation3], 2048  }
  0x13   :  { %271 = vsyncadd [#allocation3], 4294965248  ;;  %v277_v0 = vmov 0.0|0.0   ;;  %vm278_vm0 = vmmov 0   ;;  %v279_v1 = vmov 0.0   ;;  %v30_v2 = vld [vmem:[#allocation2] sm:$0xff] }
  0x14   :  { %193 = vmatprep.subr.bf16.mxu0 %v277_v0  ;;  %190 = vmatprep.mubr.msk.f32.mxu0 %vm278_vm0, %v279_v1  ;;  %v31_v3 = vld [vmem:[#allocation2 + $0x8] sm:$0xff]  ;;  %v32_v5 = vld [vmem:[#allocation2 + $0x10] sm:$0xff]  ;;  %v33_v6 = vld [vmem:[#allocation2 + $0x18] sm:$0xff]  ;;  %s280_s29 = smov [#allocation5]  }
  0x15   :  { %v194_v4 = vpack.c.bf16 %v31_v3, %v30_v2  ;;  %v197_v7 = vpack.c.bf16 %v33_v6, %v32_v5  ;;  %v34_v8 = vld [vmem:[#allocation2 + $0x20] sm:$0xff]  ;;  %v35_v9 = vld [vmem:[#allocation2 + $0x28] sm:$0xff]  ;;  %v36_v11 = vld [vmem:[#allocation2 + $0x30] sm:$0xff]  ;;  %s131_s30 = sshll.u32 %s280_s29, 4  ;;  %s132_s30 = int_to_ptr.vmem [resolvable:$true] %s131_s30 }
  0x16   :  { %v200_v10 = vpack.c.bf16 %v35_v9, %v34_v8  ;;  %v37_v12 = vld [vmem:[#allocation2 + $0x38] sm:$0xff]  ;;  %v38_v14 = vld [vmem:[#allocation2 + $0x40] sm:$0xff]  ;;  %v39_v15 = vld [vmem:[#allocation2 + $0x48] sm:$0xff]  ;;  %s248_s4 = scalar_lea.vmem %s132_s30, 32  ;;  %p253_p9 = scmp.lt.s32.totalorder %s132_s30, %s132_s30 }
  0x17   :  { %195 = vmatpush3.bf16.xpose.msra.mxu0 %v194_v4  ;;  %v203_v13 = vpack.c.bf16 %v37_v12, %v36_v11  ;;  %v206_v16 = vpack.c.bf16 %v39_v15, %v38_v14  ;;  %v40_v17 = vld [vmem:[#allocation2 + $0x50] sm:$0xff]  ;;  %v41_v18 = vld [vmem:[#allocation2 + $0x58] sm:$0xff]  ;;  %v42_v20 = vld [vmem:[#allocation2 + $0x60] sm:$0xff]  ;;  %p249_p8 = scmp.ne.s32.totalorder %s132_s30, %s248_s4  ;;  %p254_p10 = scmp.lt.s32.totalorder %s248_s4, %s248_s4 }
  0x18   :  { %196 = vmatprep.subr.bf16.mxu0 %v277_v0  ;;  %v209_v19 = vpack.c.bf16 %v41_v18, %v40_v17  ;;  %v43_v21 = vld [vmem:[#allocation2 + $0x68] sm:$0xff]  ;;  %v44_v23 = vld [vmem:[#allocation2 + $0x70] sm:$0xff]  ;;  %v45_v24 = vld [vmem:[#allocation2 + $0x78] sm:$0xff] }
  0x19   :  { %v212_v22 = vpack.c.bf16 %v43_v21, %v42_v20  ;;  %v215_v25 = vpack.c.bf16 %v45_v24, %v44_v23  ;;  %v29_v26 = vld [vmem:[%s331_s0] sm:$0x3]  ;;  %p255_p11 = por %p254_p10, %p253_p9 }
  0x1a   :  { %v140_v27 = vld [vmem:[%s333_s2] ss:$0 sm:$0xff] }
  0x1b   :  { %p256_p12 = pnand %p255_p11, %p249_p8 }
  0x1f   :  { %198 = vmatpush3.bf16.xpose.msra.mxu0 %v197_v7 }
  0x20   :  { %199 = vmatprep.subr.bf16.mxu0 %v277_v0 }
  0x27   :  { %201 = vmatpush3.bf16.xpose.msra.mxu0 %v200_v10 }
  0x28   :  { %202 = vmatprep.subr.bf16.mxu0 %v277_v0 }
  0x2f   :  { %204 = vmatpush3.bf16.xpose.msra.mxu0 %v203_v13 }
  0x30   :  { %205 = vmatprep.subr.bf16.mxu0 %v277_v0 }
  0x37   :  { %207 = vmatpush3.bf16.xpose.msra.mxu0 %v206_v16 }
  0x38   :  { %208 = vmatprep.subr.bf16.mxu0 %v277_v0 }
  0x3f   :  { %210 = vmatpush3.bf16.xpose.msra.mxu0 %v209_v19 }
  0x40   :  { %211 = vmatprep.subr.bf16.mxu0 %v277_v0 }
  0x47   :  { %213 = vmatpush3.bf16.xpose.msra.mxu0 %v212_v22 }
  0x48   :  { %214 = vmatprep.subr.bf16.mxu0 %v277_v0 }
  0x4f   :  { %216 = vmatpush3.bf16.xpose.msra.mxu0 %v215_v25 }
  0x56   :  { %191 = vmatmul.mubr.f32.vlgmr.msra.gmra.mrb[0].mxu0 %v29_v26 }
 0x129   :  { %v119_v28 = vpop.f32.mrb[0].mxu0 }
 0x12a   :  { %v120_v29 = vadd.f32 %v140_v27, %v119_v28  ;;  %v192_v30 = vpop.f32.mrb[1].mxu0 }
 0x12c   :  { %224 = vtanh.f32 %v120_v29 }
 0x136   :  { %v225_v31 = vpop.eup %224 }
 0x137   :  { %124 = vst [vmem:[#allocation5] sm:$0x3] %v225_v31 }
 0x138   :  { %259 = shalt.err (!%p256_p12)
}
 0x139   :  { %s260_s2 = scalar_lea.hbm %s334_s3, 32 }
 0x13a   :  { %p261_p13 = scmp.ne.s32.totalorder %s334_s3, %s260_s2  ;;  %p264_p0 = scmp.lt.u32.totalorder %s260_s2, %s334_s3 }
 0x13c   :  { %p266_p1 = pnand %p264_p0, %p261_p13 }
 0x13e   :  { %269 = shalt.err (!%p266_p1)
}
 0x13f   :  { %134 = dma.vmem_to_hbm [thread:$0]  %s132_s30, 32, %s334_s3, [#allocation4]  }
 0x140   :  { %272 = dma.done.wait [#allocation4], 32  }
 0x141   :  { %273 = vsyncadd [#allocation4], 4294967264 }
 0x142   :  { %138 = vsyncpa [#allocation3], 1 }
 0x143   :  { %139 = vsyncpa [#allocation4], 1 }

</bundles_post_ra>
